<compile_context>
chip_gen: v7x
topology: tpu7x:2x2x1
jax: 0.10.0
libtpu: 0.0.40
codegen_flags: <defaults>
</compile_context>

<pallas_src>
import jax
import jax.numpy as jnp
from jax.experimental import pallas as pl
from jax.experimental.pallas import tpu as pltpu

LANE = 128


def _round_up(n: int, m: int) -> int:
    return ((n + m - 1) // m) * m


def mlp_kernel(x_ref, w1_ref, b1_ref, w2_ref, b2_ref, o_ref):
    # Fused Linear -> ReLU -> (eval-mode Dropout == identity) -> Linear.
    # bf16 operands on the MXU, f32 accumulation; bias add + ReLU stay in f32.
    h = jnp.dot(x_ref[...], w1_ref[...], preferred_element_type=jnp.float32)
    h = jnp.maximum(h + b1_ref[...], 0.0)                 # bias + ReLU in f32
    h = h.astype(w2_ref.dtype)                            # explicit f32 -> bf16 for MXU pass 2
    y = jnp.dot(h, w2_ref[...], preferred_element_type=jnp.float32) + b2_ref[...]
    o_ref[...] = y.astype(o_ref.dtype)


def simple_mlp_forward(x, w1, b1, w2, b2, *, block_batch=256):
    """SimpleMLP forward.

    x:(B, in_dim) f32, w1:(in_dim, hidden), b1:(1, hidden),
    w2:(hidden, out_dim), b2:(1, out_dim)   (weights transposed vs PyTorch).
    Returns (B, out_dim) f32.
    """
    batch, in_dim = x.shape
    hidden = w1.shape[1]
    out_dim = w2.shape[1]

    # Lane-dense padding of the MXU-facing dims (hidden, out) to multiples of 128.
    h_pad = _round_up(hidden, LANE)
    o_pad = _round_up(out_dim, LANE)

    # bf16 inputs / weights halve HBM traffic; zero padding keeps padded lanes exact.
    x_bf = x.astype(jnp.bfloat16)
    w1_p = jnp.pad(w1, ((0, 0), (0, h_pad - hidden))).astype(jnp.bfloat16)
    b1_p = jnp.pad(b1, ((0, 0), (0, h_pad - hidden))).astype(jnp.float32)
    w2_p = jnp.pad(w2, ((0, h_pad - hidden), (0, o_pad - out_dim))).astype(jnp.bfloat16)
    b2_p = jnp.pad(b2, ((0, 0), (0, o_pad - out_dim))).astype(jnp.float32)

    # Batch tile: biggest tile up to block_batch rows. For these dims the
    # double-buffered x/out tiles + resident weights stay far below the v7x
    # 64 MiB VMEM budget; tb is a multiple of 8 (or the full batch).
    tb = batch if batch <= block_batch else block_batch
    grid = (pl.cdiv(batch, tb),)

    flops = 2 * batch * (in_dim * h_pad + h_pad * o_pad)
    bytes_accessed = (x_bf.size * 2 + w1_p.size * 2 + w2_p.size * 2
                      + b1_p.size * 4 + b2_p.size * 4 + batch * o_pad * 4)

    out_padded = pl.pallas_call(
        mlp_kernel,
        out_shape=jax.ShapeDtypeStruct((batch, o_pad), jnp.float32),
        grid=grid,
        in_specs=[
            pl.BlockSpec((tb, in_dim), lambda i: (i, 0)),      # x tile (pipelined)
            pl.BlockSpec((in_dim, h_pad), lambda i: (0, 0)),   # W1 (resident)
            pl.BlockSpec((1, h_pad), lambda i: (0, 0)),        # b1 (resident)
            pl.BlockSpec((h_pad, o_pad), lambda i: (0, 0)),    # W2 (resident)
            pl.BlockSpec((1, o_pad), lambda i: (0, 0)),        # b2 (resident)
        ],
        out_specs=pl.BlockSpec((tb, o_pad), lambda i: (i, 0)),
        compiler_params=pltpu.CompilerParams(
            dimension_semantics=("parallel",)),
        cost_estimate=pl.CostEstimate(flops=flops, transcendentals=0,
                                      bytes_accessed=bytes_accessed),
    )(x_bf, w1_p, b1_p, w2_p, b2_p)

    # Slice the lane-padded output back to the real output_dim.
    return out_padded[:, :out_dim]


def xavier_uniform(key, fan_in, fan_out, dtype=jnp.float32):
    # Matches torch.nn.init.xavier_uniform_: U(-a, a), a = sqrt(6/(fan_in+fan_out)).
    bound = jnp.sqrt(6.0 / (fan_in + fan_out))
    return jax.random.uniform(key, (fan_in, fan_out), dtype=dtype,
                              minval=-bound, maxval=bound)


if __name__ == "__main__":
    # Module config: SimpleMLP(input_dim=32, hidden_dim=32, output_dim=16, dropout_p=0.5)
    input_dim, hidden_dim, output_dim = 32, 32, 16
    batch = 8

    key = jax.random.PRNGKey(0)
    k_x, k_w1, k_w2 = jax.random.split(key, 3)

    x = jax.random.normal(k_x, (batch, input_dim), dtype=jnp.float32)

    # Deterministic parameter init (xavier_uniform weights, zero biases).
    w1 = xavier_uniform(k_w1, input_dim, hidden_dim)
    b1 = jnp.zeros((1, hidden_dim), dtype=jnp.float32)
    w2 = xavier_uniform(k_w2, hidden_dim, output_dim)
    b2 = jnp.zeros((1, output_dim), dtype=jnp.float32)

    out = simple_mlp_forward(x, w1, b1, w2, b2)
    out = jax.block_until_ready(out)

    # Pure-JAX reference with the same bf16-rounded operands and f32 accumulation
    # (eval-mode dropout == identity).
    xr = x.astype(jnp.bfloat16).astype(jnp.float32)
    w1r = w1.astype(jnp.bfloat16).astype(jnp.float32)
    w2r = w2.astype(jnp.bfloat16).astype(jnp.float32)
    h_ref = jnp.maximum(xr @ w1r + b1, 0.0)
    h_ref = h_ref.astype(jnp.bfloat16).astype(jnp.float32)
    ref = h_ref @ w2r + b2

    assert out.shape == (batch, output_dim)
    assert jnp.allclose(out, ref, atol=1e-3, rtol=1e-3)

    print("KERNEL_OK")
</pallas_src>

<mosaic_0001>
module attributes {stable_mosaic.version = 11 : i64} {
  func.func @mlp_kernel(%arg0: i32, %arg1: memref<8x32xbf16, #tpu.memory_space<vmem>>, %arg2: memref<32x128xbf16, #tpu.memory_space<vmem>>, %arg3: memref<1x128xf32, #tpu.memory_space<vmem>>, %arg4: memref<128x128xbf16, #tpu.memory_space<vmem>>, %arg5: memref<1x128xf32, #tpu.memory_space<vmem>>, %arg6: memref<8x128xf32, #tpu.memory_space<vmem>>) attributes {dimension_semantics = [#tpu.dimension_semantics<parallel>], iteration_bounds = array<i64: 1>, scalar_prefetch = 0 : i64, scratch_operands = 0 : i64, tpu.core_type = #tpu.core_type<tc>, window_params = [{transform_indices = @transform_0, window_bounds = array<i64: 8, 32>}, {pipeline_mode = #tpu.pipeline_mode<synchronous>, transform_indices = @transform_1, window_bounds = array<i64: 32, 128>}, {pipeline_mode = #tpu.pipeline_mode<synchronous>, transform_indices = @transform_2, window_bounds = array<i64: 1, 128>}, {pipeline_mode = #tpu.pipeline_mode<synchronous>, transform_indices = @transform_3, window_bounds = array<i64: 128, 128>}, {pipeline_mode = #tpu.pipeline_mode<synchronous>, transform_indices = @transform_4, window_bounds = array<i64: 1, 128>}, {transform_indices = @transform_5, window_bounds = array<i64: 8, 128>}]} {
    %c0 = arith.constant 0 : index
    %c0_0 = arith.constant 0 : index
    %0 = vector.load %arg1[%c0, %c0_0] : memref<8x32xbf16, #tpu.memory_space<vmem>>, vector<8x32xbf16>
    %c0_1 = arith.constant 0 : index
    %c0_2 = arith.constant 0 : index
    %1 = vector.load %arg2[%c0_1, %c0_2] : memref<32x128xbf16, #tpu.memory_space<vmem>>, vector<32x128xbf16>
    %cst = arith.constant dense<0.000000e+00> : vector<8x128xf32>
    %2 = tpu.matmul %0, %1, %cst {dimension_numbers = #tpu.dot_dimension_numbers<[1], [0], [0], [1], [0, 0, 1, 1], [], []>} : vector<8x32xbf16>, vector<32x128xbf16>, vector<8x128xf32> -> vector<8x128xf32>
    %c0_3 = arith.constant 0 : index
    %c0_4 = arith.constant 0 : index
    %3 = vector.load %arg3[%c0_3, %c0_4] : memref<1x128xf32, #tpu.memory_space<vmem>>, vector<1x128xf32>
    %4 = vector.broadcast %3 : vector<1x128xf32> to vector<8x128xf32>
    %5 = arith.addf %2, %4 : vector<8x128xf32>
    %cst_5 = arith.constant 0.000000e+00 : f32
    %6 = vector.broadcast %cst_5 : f32 to vector<8x128xf32>
    %7 = arith.maximumf %5, %6 : vector<8x128xf32>
    %8 = arith.truncf %7 : vector<8x128xf32> to vector<8x128xbf16>
    %c0_6 = arith.constant 0 : index
    %c0_7 = arith.constant 0 : index
    %9 = vector.load %arg4[%c0_6, %c0_7] : memref<128x128xbf16, #tpu.memory_space<vmem>>, vector<128x128xbf16>
    %cst_8 = arith.constant dense<0.000000e+00> : vector<8x128xf32>
    %10 = tpu.matmul %8, %9, %cst_8 {dimension_numbers = #tpu.dot_dimension_numbers<[1], [0], [0], [1], [0, 0, 1, 1], [], []>} : vector<8x128xbf16>, vector<128x128xbf16>, vector<8x128xf32> -> vector<8x128xf32>
    %c0_9 = arith.constant 0 : index
    %c0_10 = arith.constant 0 : index
    %11 = vector.load %arg5[%c0_9, %c0_10] : memref<1x128xf32, #tpu.memory_space<vmem>>, vector<1x128xf32>
    %12 = vector.broadcast %11 : vector<1x128xf32> to vector<8x128xf32>
    %13 = arith.addf %10, %12 : vector<8x128xf32>
    %c0_11 = arith.constant 0 : index
    %c0_12 = arith.constant 0 : index
    %14 = vector.load %arg6[%c0_11, %c0_12] : memref<8x128xf32, #tpu.memory_space<vmem>>, vector<8x128xf32>
    tpu.vector_store %arg6[%c0_11, %c0_12], %13 {strides = array<i32>} : memref<8x128xf32, #tpu.memory_space<vmem>>, vector<8x128xf32>,
    return
  }
  func.func @transform_0(%arg0: i32) -> (i32, i32) {
    %c0_i32 = arith.constant 0 : i32
    %c0_i32_0 = arith.constant 0 : i32
    return %arg0, %c0_i32 : i32, i32
  }
  func.func @transform_1(%arg0: i32) -> (i32, i32) {
    %c0_i32 = arith.constant 0 : i32
    %c0_i32_0 = arith.constant 0 : i32
    %c0_i32_1 = arith.constant 0 : i32
    return %c0_i32, %c0_i32_0 : i32, i32
  }
  func.func @transform_2(%arg0: i32) -> (i32, i32) {
    %c0_i32 = arith.constant 0 : i32
    %c0_i32_0 = arith.constant 0 : i32
    %c0_i32_1 = arith.constant 0 : i32
    return %c0_i32, %c0_i32_0 : i32, i32
  }
  func.func @transform_3(%arg0: i32) -> (i32, i32) {
    %c0_i32 = arith.constant 0 : i32
    %c0_i32_0 = arith.constant 0 : i32
    %c0_i32_1 = arith.constant 0 : i32
    return %c0_i32, %c0_i32_0 : i32, i32
  }
  func.func @transform_4(%arg0: i32) -> (i32, i32) {
    %c0_i32 = arith.constant 0 : i32
    %c0_i32_0 = arith.constant 0 : i32
    %c0_i32_1 = arith.constant 0 : i32
    return %c0_i32, %c0_i32_0 : i32, i32
  }
  func.func @transform_5(%arg0: i32) -> (i32, i32) {
    %c0_i32 = arith.constant 0 : i32
    %c0_i32_0 = arith.constant 0 : i32
    return %arg0, %c0_i32 : i32, i32
  }
}

</mosaic_0001>

<bundles_post_ra>
// kernel: tpu_custom_call.1
= control target key start
LH: loop header
LB: loop body
LE: loop exit
PB: predicated region body
PF: predicated region fallthrough
CT: control target
= control target key end

     0   :  { %10 = vsyncpa [#allocation3], 0  ;;  %s522_s0 = inlined_call_operand.hbm [shape: bf16[8,32], index: 0, kind: input, shape index: {}]   ;;  %s523_s1 = inlined_call_operand.hbm [shape: bf16[32,128], index: 1, kind: input, shape index: {}]   ;;  %s524_s2 = inlined_call_operand.vmem [shape: f32[1,128], index: 2, kind: input, shape index: {}]   ;;  %s525_s3 = inlined_call_operand.hbm [shape: bf16[128,128], index: 3, kind: input, shape index: {}]   ;;  %s526_s4 = inlined_call_operand.vmem [shape: f32[1,128], index: 4, kind: input, shape index: {}]   ;;  %s527_s5 = inlined_call_operand.hbm [shape: f32[8,128], index: 5, kind: output, shape index: {}]  }
   0x1   :  { %11 = vsyncpa [#allocation6], 0 }
   0x2   :  { %12 = vsyncpa [#allocation4], 0  ;;  %s424_s18 = smov [#allocation5]   ;;  %s330_s22 = scalar_lea.hbm %s523_s1, 256 }
   0x3   :  { %s28_s19 = sshll.u32 %s424_s18, 4  ;;  %p331_p0 = scmp.ne.s32.totalorder %s523_s1, %s330_s22  ;;  %s29_s19 = int_to_ptr.vmem [resolvable:$true] %s28_s19 }
   0x4   :  { %p334_p1 = scmp.lt.u32.totalorder %s330_s22, %s523_s1 }
   0x6   :  { %p336_p2 = pnand %p334_p1, %p331_p0 }
   0x8   :  { %339 = shalt.err (!%p336_p2)
}
   0x9   :  { %s340_s27 = scalar_lea.vmem %s29_s19, 256  ;;  %p345_p4 = scmp.lt.s32.totalorder %s29_s19, %s29_s19 }
   0xa   :  { %p341_p3 = scmp.ne.s32.totalorder %s29_s19, %s340_s27  ;;  %p346_p5 = scmp.lt.s32.totalorder %s340_s27, %s340_s27 }
   0xc   :  { %p347_p6 = por %p346_p5, %p345_p4 }
   0xe   :  { %p348_p7 = pnand %p347_p6, %p341_p3 }
  0x10   :  { %351 = shalt.err (!%p348_p7)
}
  0x11   :  { %s425_s28 = smov 64   ;;  %s426_s29 = smov 4  }
  0x12   :  { %34 = dma.hbm_to_vmem [thread:$0]  %s523_s1, 256, %s29_s19, [#allocation6], %s425_s28, %s425_s28, %s426_s29  }
  0x13   :  { %s427_s7 = smov [#allocation2]   ;;  %s428_s9 = smov [#allocation7]  }
  0x14   :  { %s19_s8 = sshll.u32 %s427_s7, 4  ;;  %s42_s10 = sshll.u32 %s428_s9, 4  ;;  %s20_s8 = int_to_ptr.vmem [resolvable:$true] %s19_s8  ;;  %s43_s10 = int_to_ptr.vmem [resolvable:$true] %s42_s10 }
  0x15   :  { %s352_s13 = scalar_lea.hbm %s522_s0, 64 }
  0x16   :  { %p353_p8 = scmp.ne.s32.totalorder %s522_s0, %s352_s13  ;;  %p356_p9 = scmp.lt.u32.totalorder %s352_s13, %s522_s0 }
  0x18   :  { %p358_p10 = pnand %p356_p9, %p353_p8 }
  0x1a   :  { %361 = shalt.err (!%p358_p10)
}
  0x1b   :  { %s362_s1 = scalar_lea.vmem %s20_s8, 64  ;;  %p367_p12 = scmp.lt.s32.totalorder %s20_s8, %s20_s8 }
  0x1c   :  { %p363_p11 = scmp.ne.s32.totalorder %s20_s8, %s362_s1  ;;  %p368_p13 = scmp.lt.s32.totalorder %s362_s1, %s362_s1 }
  0x1e   :  { %p369_p0 = por %p368_p13, %p367_p12 }
  0x20   :  { %p370_p1 = pnand %p369_p0, %p363_p11 }
  0x22   :  { %373 = shalt.err (!%p370_p1)
}
  0x23   :  { %22 = dma.hbm_to_vmem [thread:$0]  %s522_s0, 64, %s20_s8, [#allocation3]  }
  0x24   :  { %s374_s22 = scalar_lea.hbm %s525_s3, 1024 }
  0x25   :  { %p375_p2 = scmp.ne.s32.totalorder %s525_s3, %s374_s22  ;;  %p378_p3 = scmp.lt.u32.totalorder %s374_s22, %s525_s3 }
  0x27   :  { %p380_p4 = pnand %p378_p3, %p375_p2 }
  0x29   :  { %383 = shalt.err (!%p380_p4)
}
  0x2a   :  { %s384_s27 = scalar_lea.vmem %s43_s10, 1024  ;;  %p389_p6 = scmp.lt.s32.totalorder %s43_s10, %s43_s10 }
  0x2b   :  { %p385_p5 = scmp.ne.s32.totalorder %s43_s10, %s384_s27  ;;  %p390_p7 = scmp.lt.s32.totalorder %s384_s27, %s384_s27 }
  0x2d   :  { %p391_p8 = por %p390_p7, %p389_p6 }
  0x2f   :  { %p392_p9 = pnand %p391_p8, %p385_p5 }
  0x31   :  { %395 = shalt.err (!%p392_p9)
}
  0x32   :  { %48 = dma.hbm_to_vmem [thread:$0]  %s525_s3, 1024, %s43_s10, [#allocation6], %s425_s28, %s425_s28, %s426_s29  }
  0x33   :  { %418 = dma.done.wait [#allocation3], 64  }
  0x34   :  { %419 = vsyncadd [#allocation3], 4294967232 }
  0x35   :  { %420 = dma.done.wait [#allocation6], 1280  }
  0x36   :  { %421 = vsyncadd [#allocation6], 4294966016  ;;  %v429_v0 = vmov 0.0   ;;  %vm430_vm0 = vmmov 0   ;;  %v320_v1 = vld [vmem:[#allocation5] sm:$0xff]   ;;  %v321_v2 = vld [vmem:[#allocation5 + $0x8] sm:$0xff]  }
  0x37   :  { %284 = vmatprep.subr.bf16.mxu0 %v429_v0  ;;  %288 = vmatprep.mubr.msk.bf16.mxu0 %vm430_vm0, %v429_v0  ;;  %v322_v3 = vld [vmem:[#allocation7] sm:$0xff]   ;;  %vm85_vm1 = vcmask 261120   ;;  %v323_v4 = vld [vmem:[#allocation7 + $0x8] sm:$0xff]   ;;  %v324_v6 = vld [vmem:[#allocation7 + $0x10] sm:$0xff]   ;;  %s431_s7 = smov [#allocation8]  }
  0x38   :  { %292 = vmatprep.subr.bf16.mxu1 %v429_v0  ;;  %308 = vmatprep.mubr.msk.bf16.mxu1 %vm430_vm0, %v429_v0  ;;  %v61_v5 = vld [vmem:[#allocation2] sm:$0xf]  ;;  %v325_v7 = vld [vmem:[#allocation7 + $0x18] sm:$0xff]   ;;  %v326_v8 = vld [vmem:[#allocation7 + $0x20] sm:$0xff]   ;;  %s249_s8 = sshll.u32 %s431_s7, 4  ;;  %s250_s8 = int_to_ptr.vmem [resolvable:$true] %s249_s8 }
  0x39   :  { %285 = vmatpush3.bf16.msra.mxu0 %v320_v1  ;;  %293 = vmatpush3.bf16.msra.mxu1 %v322_v3  ;;  %v327_v9 = vld [vmem:[#allocation7 + $0x28] sm:$0xff]   ;;  %v328_v10 = vld [vmem:[#allocation7 + $0x30] sm:$0xff]   ;;  %v329_v11 = vld [vmem:[#allocation7 + $0x38] sm:$0xff]   ;;  %p401_p11 = scmp.lt.s32.totalorder %s250_s8, %s250_s8 }
  0x3a   :  { %286 = vmatprep.subr.bf16.mxu0 %v429_v0  ;;  %294 = vmatprep.subr.bf16.mxu1 %v429_v0  ;;  %v259_v12 = vld [vmem:[%s524_s2] ss:$0 sm:$0xff]  ;;  %s396_s2 = scalar_lea.vmem %s250_s8, 128 }
  0x3b   :  { %v263_v20 = vld [vmem:[%s526_s4] ss:$0 sm:$0xff]  ;;  %p397_p10 = scmp.ne.s32.totalorder %s250_s8, %s396_s2  ;;  %p402_p12 = scmp.lt.s32.totalorder %s396_s2, %s396_s2 }
  0x3d   :  { %287 = vmatpush3.bf16.msra.mxu0 %v321_v2  ;;  %295 = vmatpush3.bf16.msra.mxu1 %v323_v4  ;;  %p403_p13 = por %p402_p12, %p401_p11 }
  0x3e   :  { %296 = vmatprep.subr.bf16.mxu1 %v429_v0 }
  0x3f   :  { %p404_p0 = pnand %p403_p13, %p397_p10 }
  0x40   :  { %289 = vmatmul.mubr.msk.bf16.vlgmr.msra.gmra.mrb[0].mxu0 %vm85_vm1, %v61_v5 }
  0x41   :  { %297 = vmatpush3.bf16.msra.mxu1 %v324_v6 }
  0x42   :  { %298 = vmatprep.subr.bf16.mxu1 %v429_v0 }
  0x45   :  { %299 = vmatpush3.bf16.msra.mxu1 %v325_v7 }
  0x46   :  { %300 = vmatprep.subr.bf16.mxu1 %v429_v0 }
  0x49   :  { %301 = vmatpush3.bf16.msra.mxu1 %v326_v8 }
  0x4a   :  { %302 = vmatprep.subr.bf16.mxu1 %v429_v0 }
  0x4d   :  { %303 = vmatpush3.bf16.msra.mxu1 %v327_v9 }
  0x4e   :  { %304 = vmatprep.subr.bf16.mxu1 %v429_v0 }
  0x51   :  { %305 = vmatpush3.bf16.msra.mxu1 %v328_v10 }
  0x52   :  { %306 = vmatprep.subr.bf16.mxu1 %v429_v0 }
  0x55   :  { %307 = vmatpush3.bf16.msra.mxu1 %v329_v11 }
 0x113   :  { %v123_v13 = vpop.f32.mrb[0].mxu0 }
 0x114   :  { %v124_v14 = vadd.f32 %v259_v12, %v123_v13  ;;  %v290_v15 = vpop.f32.mrb[1].mxu0 }
 0x115   :  { %v126_v16 = vpop.f32.mrb[2].mxu0 }
 0x116   :  { %v129_v17 = vmax.f32 %v124_v14, 0.0  ;;  %v291_v18 = vpop.f32.mrb[3].mxu0 }
 0x118   :  { %v130_v19 = vpack.c.bf16 %v129_v17, %v129_v17 }
 0x11a   :  { %309 = vmatmul.mubr.bf16.vlgmr.msra.gmra.mrb[0].mxu1 %v130_v19 }
 0x1ed   :  { %v236_v21 = vpop.f32.mrb[0].mxu1 }
 0x1ee   :  { %v237_v22 = vadd.f32 %v263_v20, %v236_v21  ;;  %v310_v23 = vpop.f32.mrb[1].mxu1 }
 0x1ef   :  { %v239_v24 = vpop.f32.mrb[2].mxu1 }
 0x1f0   :  { %242 = vst [vmem:[#allocation8] sm:$0xff] %v237_v22  ;;  %v311_v25 = vpop.f32.mrb[3].mxu1 }
 0x1f1   :  { %407 = shalt.err (!%p404_p0)
}
 0x1f2   :  { %s408_s4 = scalar_lea.hbm %s527_s5, 128 }
 0x1f3   :  { %p409_p1 = scmp.ne.s32.totalorder %s527_s5, %s408_s4  ;;  %p412_p2 = scmp.lt.u32.totalorder %s408_s4, %s527_s5 }
 0x1f5   :  { %p414_p3 = pnand %p412_p2, %p409_p1 }
 0x1f7   :  { %417 = shalt.err (!%p414_p3)
}
 0x1f8   :  { %252 = dma.vmem_to_hbm [thread:$0]  %s250_s8, 128, %s527_s5, [#allocation4]  }
 0x1f9   :  { %422 = dma.done.wait [#allocation4], 128  }
 0x1fa   :  { %423 = vsyncadd [#allocation4], 4294967168 }
 0x1fb   :  { %256 = vsyncpa [#allocation3], 1 }
 0x1fc   :  { %257 = vsyncpa [#allocation6], 1 }
 0x1fd   :  { %258 = vsyncpa [#allocation4], 1 }

</bundles_post_ra>
